<compile_context>
chip_gen: v6e
topology: v6e:2x2x1
jax: 0.10.0
libtpu: 0.0.40
codegen_flags: <defaults>
</compile_context>

<pallas_src>
import functools

import jax
import jax.numpy as jnp
from jax.experimental import pallas as pl
from jax.experimental.pallas import tpu as pltpu


def _flash_sdpa_kernel(q_ref, k_ref, v_ref, o_ref, m_sc, l_sc, acc_sc, *, scale):
    # q_ref: (hblk, tq, D), k_ref/v_ref: (hblk, tk, D), o_ref: (hblk, tq, D)
    # m_sc/l_sc: (hblk, tq, 1) f32, acc_sc: (hblk, tq, D) f32
    kv = pl.program_id(2)

    @pl.when(kv == 0)
    def _():
        m_sc[...] = jnp.full(m_sc.shape, -jnp.inf, jnp.float32)
        l_sc[...] = jnp.zeros(l_sc.shape, jnp.float32)
        acc_sc[...] = jnp.zeros(acc_sc.shape, jnp.float32)

    # Scale q (tq*D elements), not the scores (tq*tk elements). Stays in the
    # input dtype (weak-typed python float keeps bf16 as bf16).
    q = q_ref[...] * scale
    k = k_ref[...]
    v = v_ref[...]

    # scores = (q/T) @ k^T without materializing a transpose: contract D of both.
    s = jnp.einsum("hqd,hkd->hqk", q, k, preferred_element_type=jnp.float32)

    # Online (streaming) softmax update in f32.
    m_prev = m_sc[...]
    m_new = jnp.maximum(m_prev, jnp.max(s, axis=-1, keepdims=True))
    alpha = jnp.exp(m_prev - m_new)
    p = jnp.exp(s - m_new)
    l_sc[...] = alpha * l_sc[...] + jnp.sum(p, axis=-1, keepdims=True)
    acc_sc[...] = alpha * acc_sc[...] + jnp.einsum(
        "hqk,hkd->hqd", p.astype(v.dtype), v, preferred_element_type=jnp.float32
    )
    m_sc[...] = m_new

    # dropout (eval mode) == identity

    @pl.when(kv == pl.num_programs(2) - 1)
    def _():
        # Single normalization per q tile. Exact reciprocal keeps the f32 test
        # tolerance tight; for bf16 production outputs approx=True (EUP vrcp)
        # is the cheaper choice.
        inv_l = pl.reciprocal(l_sc[...], approx=False)
        o_ref[...] = (acc_sc[...] * inv_l).astype(o_ref.dtype)


def _choose_tile(n, target):
    """Largest tile <= target that divides n and is a multiple of 8, else full n."""
    if n % target == 0:
        return target
    t = target
    while t >= 8:
        if n % t == 0:
            return t
        t -= 8
    return n


def scaled_dot_product_attention(q, k, v, temperature, *, tq_target=128, tk_target=512):
    """q: [B, H, Lq, D], k/v: [B, H, Lk, D] -> [B, H, Lq, D]."""
    B, H, Lq, D = q.shape
    Lk = k.shape[2]

    # Pack several heads per grid step when D < 128 so each grid step presents
    # wider MXU contractions / stores (lane-density lever for small head dims).
    if D >= 128:
        hblk = 1
    else:
        cap = max(1, 128 // D)
        hblk = 1
        for h in range(min(H, cap), 0, -1):
            if H % h == 0:
                hblk = h
                break

    tq = _choose_tile(Lq, tq_target)
    tk = _choose_tile(Lk, tk_target)

    G = (B * H) // hblk  # number of head-groups
    q4 = q.reshape(G, hblk, Lq, D)
    k4 = k.reshape(G, hblk, Lk, D)
    v4 = v.reshape(G, hblk, Lk, D)

    kernel = functools.partial(_flash_sdpa_kernel, scale=1.0 / float(temperature))

    out = pl.pallas_call(
        kernel,
        out_shape=jax.ShapeDtypeStruct((G, hblk, Lq, D), q.dtype),
        grid_spec=pltpu.PrefetchScalarGridSpec(
            num_scalar_prefetch=0,
            grid=(G, Lq // tq, Lk // tk),  # reduction (kv) axis last
            in_specs=[
                pl.BlockSpec((pl.Squeezed(), hblk, tq, D), lambda g, qi, ki: (g, 0, qi, 0)),
                pl.BlockSpec((pl.Squeezed(), hblk, tk, D), lambda g, qi, ki: (g, 0, ki, 0)),
                pl.BlockSpec((pl.Squeezed(), hblk, tk, D), lambda g, qi, ki: (g, 0, ki, 0)),
            ],
            out_specs=pl.BlockSpec(
                (pl.Squeezed(), hblk, tq, D), lambda g, qi, ki: (g, 0, qi, 0)
            ),
            scratch_shapes=[
                pltpu.VMEM((hblk, tq, 1), jnp.float32),  # running max m
                pltpu.VMEM((hblk, tq, 1), jnp.float32),  # running denom l
                pltpu.VMEM((hblk, tq, D), jnp.float32),  # f32 output accumulator
            ],
        ),
        compiler_params=pltpu.CompilerParams(
            # head-groups and q-tiles shard across TensorCores (v7x megacore);
            # kv axis is a sequential reduction.
            dimension_semantics=("parallel", "parallel", "arbitrary"),
            # Explicit scoped-VMEM budget with headroom under v7x's 64 MiB.
            vmem_limit_bytes=48 * 1024 * 1024,
        ),
    )(q4, k4, v4)

    return out.reshape(B, H, Lq, D)


def _reference(q, k, v, temperature):
    attn = jnp.matmul(q / temperature, jnp.swapaxes(k, 2, 3))
    attn = jax.nn.softmax(attn, axis=-1)
    return jnp.matmul(attn, v)


if __name__ == "__main__":
    B, H, Lq, Lk, D = 2, 2, 8, 8, 32
    temperature = float(D) ** 0.5

    key = jax.random.PRNGKey(0)
    kq, kk, kv = jax.random.split(key, 3)
    q = jax.random.normal(kq, (B, H, Lq, D), dtype=jnp.float32)
    k = jax.random.normal(kk, (B, H, Lk, D), dtype=jnp.float32)
    v = jax.random.normal(kv, (B, H, Lk, D), dtype=jnp.float32)

    out = scaled_dot_product_attention(q, k, v, temperature)
    out = jax.block_until_ready(out)

    ref = _reference(q, k, v, temperature)
    assert out.shape == (B, H, Lq, D)
    assert jnp.allclose(out, ref, atol=1e-5, rtol=1e-5), "mismatch vs reference"

    print("KERNEL_OK")
</pallas_src>

<mosaic_0001>
module attributes {stable_mosaic.version = 11 : i64} {
  func.func @_flash_sdpa_kernel(%arg0: i32, %arg1: i32, %arg2: i32, %arg3: memref<1x2x8x32xf32, #tpu.memory_space<vmem>>, %arg4: memref<1x2x8x32xf32, #tpu.memory_space<vmem>>, %arg5: memref<1x2x8x32xf32, #tpu.memory_space<vmem>>, %arg6: memref<1x2x8x32xf32, #tpu.memory_space<vmem>>, %arg7: memref<2x8x1xf32, #tpu.memory_space<vmem>>, %arg8: memref<2x8x1xf32, #tpu.memory_space<vmem>>, %arg9: memref<2x8x32xf32, #tpu.memory_space<vmem>>) attributes {dimension_semantics = [#tpu.dimension_semantics<parallel>, #tpu.dimension_semantics<parallel>, #tpu.dimension_semantics<arbitrary>], iteration_bounds = array<i64: 2, 1, 1>, scalar_prefetch = 0 : i64, scratch_operands = 3 : i64, tpu.core_type = #tpu.core_type<tc>, window_params = [{transform_indices = @transform_0, window_bounds = array<i64: 1, 2, 8, 32>}, {transform_indices = @transform_1, window_bounds = array<i64: 1, 2, 8, 32>}, {transform_indices = @transform_2, window_bounds = array<i64: 1, 2, 8, 32>}, {transform_indices = @transform_3, window_bounds = array<i64: 1, 2, 8, 32>}]} {
    %c0_i32 = arith.constant 0 : i32
    %0 = arith.cmpi eq, %arg2, %c0_i32 : i32
    %1 = arith.extui %0 : i1 to i32
    %c0_i32_0 = arith.constant 0 : i32
    %2 = arith.cmpi ne, %1, %c0_i32_0 : i32
    scf.if %2 {
      %cst_36 = arith.constant 0xFF800000 : f32
      %37 = vector.broadcast %cst_36 : f32 to vector<2x8x1xf32>
      %c0_37 = arith.constant 0 : index
      %c0_38 = arith.constant 0 : index
      %c0_39 = arith.constant 0 : index
      %38 = vector.load %arg7[%c0_37, %c0_38, %c0_39] : memref<2x8x1xf32, #tpu.memory_space<vmem>>, vector<2x8x1xf32>
      tpu.vector_store %arg7[%c0_37, %c0_38, %c0_39], %37 {strides = array<i32>} : memref<2x8x1xf32, #tpu.memory_space<vmem>>, vector<2x8x1xf32>,
      %cst_40 = arith.constant 0.000000e+00 : f32
      %39 = vector.broadcast %cst_40 : f32 to vector<2x8x1xf32>
      %c0_41 = arith.constant 0 : index
      %c0_42 = arith.constant 0 : index
      %c0_43 = arith.constant 0 : index
      %40 = vector.load %arg8[%c0_41, %c0_42, %c0_43] : memref<2x8x1xf32, #tpu.memory_space<vmem>>, vector<2x8x1xf32>
      tpu.vector_store %arg8[%c0_41, %c0_42, %c0_43], %39 {strides = array<i32>} : memref<2x8x1xf32, #tpu.memory_space<vmem>>, vector<2x8x1xf32>,
      %cst_44 = arith.constant 0.000000e+00 : f32
      %41 = vector.broadcast %cst_44 : f32 to vector<2x8x32xf32>
      %c0_45 = arith.constant 0 : index
      %c0_46 = arith.constant 0 : index
      %c0_47 = arith.constant 0 : index
      %42 = vector.load %arg9[%c0_45, %c0_46, %c0_47] : memref<2x8x32xf32, #tpu.memory_space<vmem>>, vector<2x8x32xf32>
      tpu.vector_store %arg9[%c0_45, %c0_46, %c0_47], %41 {strides = array<i32>} : memref<2x8x32xf32, #tpu.memory_space<vmem>>, vector<2x8x32xf32>,
    } else {
    }
    %c0 = arith.constant 0 : index
    %c0_1 = arith.constant 0 : index
    %c0_2 = arith.constant 0 : index
    %c0_3 = arith.constant 0 : index
    %3 = vector.load %arg3[%c0, %c0_1, %c0_2, %c0_3] : memref<1x2x8x32xf32, #tpu.memory_space<vmem>>, vector<1x2x8x32xf32>
    %4 = vector.shape_cast %3 : vector<1x2x8x32xf32> to vector<2x8x32xf32>
    %cst = arith.constant 0.176776692 : f32
    %5 = vector.broadcast %cst : f32 to vector<2x8x32xf32>
    %6 = arith.mulf %4, %5 : vector<2x8x32xf32>
    %c0_4 = arith.constant 0 : index
    %c0_5 = arith.constant 0 : index
    %c0_6 = arith.constant 0 : index
    %c0_7 = arith.constant 0 : index
    %7 = vector.load %arg4[%c0_4, %c0_5, %c0_6, %c0_7] : memref<1x2x8x32xf32, #tpu.memory_space<vmem>>, vector<1x2x8x32xf32>
    %8 = vector.shape_cast %7 : vector<1x2x8x32xf32> to vector<2x8x32xf32>
    %c0_8 = arith.constant 0 : index
    %c0_9 = arith.constant 0 : index
    %c0_10 = arith.constant 0 : index
    %c0_11 = arith.constant 0 : index
    %9 = vector.load %arg5[%c0_8, %c0_9, %c0_10, %c0_11] : memref<1x2x8x32xf32, #tpu.memory_space<vmem>>, vector<1x2x8x32xf32>
    %10 = vector.shape_cast %9 : vector<1x2x8x32xf32> to vector<2x8x32xf32>
    "tpu.trace_start"() <{level = 10 : i32, message = "hqd,hkd->hqk"}> : () -> ()
    %cst_12 = arith.constant dense<0.000000e+00> : vector<2x8x8xf32>
    %11 = tpu.matmul %6, %8, %cst_12 {dimension_numbers = #tpu.dot_dimension_numbers<[2], [2], [1], [1], [0, 0, 0, 1, 1, 1], [0], [0]>} : vector<2x8x32xf32>, vector<2x8x32xf32>, vector<2x8x8xf32> -> vector<2x8x8xf32>
    "tpu.trace_stop"() : () -> ()
    %c0_13 = arith.constant 0 : index
    %c0_14 = arith.constant 0 : index
    %c0_15 = arith.constant 0 : index
    %12 = vector.load %arg7[%c0_13, %c0_14, %c0_15] : memref<2x8x1xf32, #tpu.memory_space<vmem>>, vector<2x8x1xf32>
    %cst_16 = arith.constant dense<0xFF800000> : vector<2x8xf32>
    %13 = vector.multi_reduction <maximumf>, %11, %cst_16 [2] : vector<2x8x8xf32> to vector<2x8xf32>
    %14 = vector.shape_cast %13 : vector<2x8xf32> to vector<2x8x1xf32>
    %15 = arith.maximumf %12, %14 : vector<2x8x1xf32>
    %16 = arith.subf %12, %15 : vector<2x8x1xf32>
    %17 = math.exp %16 : vector<2x8x1xf32>
    %18 = vector.broadcast %15 : vector<2x8x1xf32> to vector<2x8x8xf32>
    %19 = arith.subf %11, %18 : vector<2x8x8xf32>
    %20 = math.exp %19 : vector<2x8x8xf32>
    %c0_17 = arith.constant 0 : index
    %c0_18 = arith.constant 0 : index
    %c0_19 = arith.constant 0 : index
    %21 = vector.load %arg8[%c0_17, %c0_18, %c0_19] : memref<2x8x1xf32, #tpu.memory_space<vmem>>, vector<2x8x1xf32>
    %22 = arith.mulf %17, %21 : vector<2x8x1xf32>
    %cst_20 = arith.constant dense<0.000000e+00> : vector<2x8xf32>
    %23 = vector.multi_reduction <add>, %20, %cst_20 [2] : vector<2x8x8xf32> to vector<2x8xf32>
    %24 = vector.shape_cast %23 : vector<2x8xf32> to vector<2x8x1xf32>
    %25 = arith.addf %22, %24 : vector<2x8x1xf32>
    %c0_21 = arith.constant 0 : index
    %c0_22 = arith.constant 0 : index
    %c0_23 = arith.constant 0 : index
    %26 = vector.load %arg8[%c0_21, %c0_22, %c0_23] : memref<2x8x1xf32, #tpu.memory_space<vmem>>, vector<2x8x1xf32>
    tpu.vector_store %arg8[%c0_21, %c0_22, %c0_23], %25 {strides = array<i32>} : memref<2x8x1xf32, #tpu.memory_space<vmem>>, vector<2x8x1xf32>,
    %c0_24 = arith.constant 0 : index
    %c0_25 = arith.constant 0 : index
    %c0_26 = arith.constant 0 : index
    %27 = vector.load %arg9[%c0_24, %c0_25, %c0_26] : memref<2x8x32xf32, #tpu.memory_space<vmem>>, vector<2x8x32xf32>
    %28 = vector.broadcast %17 : vector<2x8x1xf32> to vector<2x8x32xf32>
    %29 = arith.mulf %28, %27 : vector<2x8x32xf32>
    "tpu.trace_start"() <{level = 10 : i32, message = "hqk,hkd->hqd"}> : () -> ()
    %cst_27 = arith.constant dense<0.000000e+00> : vector<2x8x32xf32>
    %30 = tpu.matmul %20, %10, %cst_27 {dimension_numbers = #tpu.dot_dimension_numbers<[2], [1], [1], [2], [0, 0, 0, 1, 1, 2], [0], [0]>} : vector<2x8x8xf32>, vector<2x8x32xf32>, vector<2x8x32xf32> -> vector<2x8x32xf32>
    "tpu.trace_stop"() : () -> ()
    %31 = arith.addf %29, %30 : vector<2x8x32xf32>
    %c0_28 = arith.constant 0 : index
    %c0_29 = arith.constant 0 : index
    %c0_30 = arith.constant 0 : index
    %32 = vector.load %arg9[%c0_28, %c0_29, %c0_30] : memref<2x8x32xf32, #tpu.memory_space<vmem>>, vector<2x8x32xf32>
    tpu.vector_store %arg9[%c0_28, %c0_29, %c0_30], %31 {strides = array<i32>} : memref<2x8x32xf32, #tpu.memory_space<vmem>>, vector<2x8x32xf32>,
    %c0_31 = arith.constant 0 : index
    %c0_32 = arith.constant 0 : index
    %c0_33 = arith.constant 0 : index
    %33 = vector.load %arg7[%c0_31, %c0_32, %c0_33] : memref<2x8x1xf32, #tpu.memory_space<vmem>>, vector<2x8x1xf32>
    tpu.vector_store %arg7[%c0_31, %c0_32, %c0_33], %15 {strides = array<i32>} : memref<2x8x1xf32, #tpu.memory_space<vmem>>, vector<2x8x1xf32>,
    %c0_i32_34 = arith.constant 0 : i32
    %34 = arith.cmpi eq, %arg2, %c0_i32_34 : i32
    %35 = arith.extui %34 : i1 to i32
    %c0_i32_35 = arith.constant 0 : i32
    %36 = arith.cmpi ne, %35, %c0_i32_35 : i32
    scf.if %36 {
      %c0_36 = arith.constant 0 : index
      %c0_37 = arith.constant 0 : index
      %c0_38 = arith.constant 0 : index
      %37 = vector.load %arg8[%c0_36, %c0_37, %c0_38] : memref<2x8x1xf32, #tpu.memory_space<vmem>>, vector<2x8x1xf32>
      %38 = tpu.reciprocal %37 : vector<2x8x1xf32> -> vector<2x8x1xf32>
      %c0_39 = arith.constant 0 : index
      %c0_40 = arith.constant 0 : index
      %c0_41 = arith.constant 0 : index
      %39 = vector.load %arg9[%c0_39, %c0_40, %c0_41] : memref<2x8x32xf32, #tpu.memory_space<vmem>>, vector<2x8x32xf32>
      %40 = vector.broadcast %38 : vector<2x8x1xf32> to vector<2x8x32xf32>
      %41 = arith.mulf %39, %40 : vector<2x8x32xf32>
      %c0_42 = arith.constant 0 : index
      %c0_43 = arith.constant 0 : index
      %c0_44 = arith.constant 0 : index
      %c0_45 = arith.constant 0 : index
      %42 = vector.load %arg6[%c0_42, %c0_43, %c0_44, %c0_45] : memref<1x2x8x32xf32, #tpu.memory_space<vmem>>, vector<1x2x8x32xf32>
      %43 = vector.shape_cast %42 : vector<1x2x8x32xf32> to vector<2x8x32xf32>
      %44 = vector.shape_cast %41 : vector<2x8x32xf32> to vector<1x2x8x32xf32>
      tpu.vector_store %arg6[%c0_42, %c0_43, %c0_44, %c0_45], %44 {strides = array<i32>} : memref<1x2x8x32xf32, #tpu.memory_space<vmem>>, vector<1x2x8x32xf32>,
    } else {
    }
    return
  }
  func.func @transform_0(%arg0: i32, %arg1: i32, %arg2: i32) -> (i32, i32, i32, i32) {
    %c0_i32 = arith.constant 0 : i32
    %c0_i32_0 = arith.constant 0 : i32
    %c0_i32_1 = arith.constant 0 : i32
    return %arg0, %c0_i32, %arg1, %c0_i32_0 : i32, i32, i32, i32
  }
  func.func @transform_1(%arg0: i32, %arg1: i32, %arg2: i32) -> (i32, i32, i32, i32) {
    %c0_i32 = arith.constant 0 : i32
    %c0_i32_0 = arith.constant 0 : i32
    %c0_i32_1 = arith.constant 0 : i32
    return %arg0, %c0_i32, %arg2, %c0_i32_0 : i32, i32, i32, i32
  }
  func.func @transform_2(%arg0: i32, %arg1: i32, %arg2: i32) -> (i32, i32, i32, i32) {
    %c0_i32 = arith.constant 0 : i32
    %c0_i32_0 = arith.constant 0 : i32
    %c0_i32_1 = arith.constant 0 : i32
    return %arg0, %c0_i32, %arg2, %c0_i32_0 : i32, i32, i32, i32
  }
  func.func @transform_3(%arg0: i32, %arg1: i32, %arg2: i32) -> (i32, i32, i32, i32) {
    %c0_i32 = arith.constant 0 : i32
    %c0_i32_0 = arith.constant 0 : i32
    %c0_i32_1 = arith.constant 0 : i32
    return %arg0, %c0_i32, %arg1, %c0_i32_0 : i32, i32, i32, i32
  }
}

</mosaic_0001>

<bundles_post_ra>
// kernel: tpu_custom_call.1
= control target key start
LH: loop header
LB: loop body
LE: loop exit
PB: predicated region body
PF: predicated region fallthrough
CT: control target
= control target key end

     0   :  { %s1462_s0 = inlined_call_operand.hbm [shape: f32[2,2,8,32], index: 0, kind: input, shape index: {}]   ;;  %s1463_s1 = inlined_call_operand.hbm [shape: f32[2,2,8,32], index: 1, kind: input, shape index: {}]   ;;  %s1464_s2 = inlined_call_operand.hbm [shape: f32[2,2,8,32], index: 2, kind: input, shape index: {}]   ;;  %s1465_s3 = inlined_call_operand.hbm [shape: f32[2,2,8,32], index: 3, kind: output, shape index: {}]  }
   0x1   :  { %1471 = sst [smem:[#allocation18_spill]] %s1463_s1 }
   0x2   :  { %8 = vsyncpa [#allocation6], 0 }
   0x3   :  { %10 = vsyncpa [#allocation6 + $0x1], 0 }
   0x4   :  { %11 = vsyncpa [#allocation9], 0 }
   0x5   :  { %13 = vsyncpa [#allocation9 + $0x1], 0 }
   0x6   :  { %14 = vsyncpa [#allocation7], 0 }
   0x7   :  { %16 = vsyncpa [#allocation7 + $0x1], 0  ;;  %s1213_s12 = smov 0   ;;  %s1215_s13 = smov 0  }
   0x8   :  { %s1217_s14 = smov 0   ;;  %s1219_s15 = smov 0  }
   0x9   :  { %s1221_s16 = smov 0   ;;  %s1223_s17 = smov 0  }
   0xa LB: > { %1472 = sst [smem:[#allocation15_spill]] %s1175_s16  ;;  %s1244_s18 = sadd.s32 4294967295, %s1179_s17   ;;  %s1179_s17 = sphi %s1223_s17, %s22_s17   ;;  %s1175_s16 = sphi %s1221_s16, %s1487_s16   ;;  %s1171_s15 = sphi %s1219_s15, %s1486_s15   ;;  %s1167_s14 = sphi %s1217_s14, %s1490_s14   ;;  %s1163_s13 = sphi %s1215_s13, %s1489_s13   ;;  %s1159_s12 = sphi %s1213_s12, %s1488_s12  }
   0xb   : > { %s857_s19 = sadd.s32 4294967294, %s1179_s17   ;;  %s41_s20 = sadd.s32 1, %s1175_s16 }
   0xc   : > { %s50_s21 = sadd.s32 1, %s1167_s14  ;;  %p43_p0 = scmp.ge.s32.totalorder %s41_s20, 2 }
   0xd   : > { %p57_p1 = scmp.ne.s32.totalorder %s1167_s14, %s1163_s13  ;;  %p58_p2 = scmp.eq.s32.totalorder %s1179_s17, 0 }
   0xe   : > { %p63_p3 = scmp.ne.s32.totalorder %s1163_s13, %s1159_s12  ;;  %s1492_s20 = smov (%p43_p0, %s41_s20), 0 }
   0xf   : > { %1473 = sst [smem:[#allocation16_spill]] %s1492_s20  ;;  %p1256_p4 = por %p58_p2, %p57_p1 }
  0x10   : > { %p64_p5 = scmp.eq.s32.totalorder %s1244_s18, 0  ;;  %s45_s23 = ssub.s32 %s1175_s16, %s1492_s20 }
  0x11   : > { %p145_p6 = scmp.eq.s32.totalorder %s1244_s18, 1  ;;  %p48_p7 = scmp.eq.s32.totalorder %s45_s23, 0 }
  0x12   : > { %p1264_p8 = por %p64_p5, %p63_p3  ;;  %p151_p10 = scmp.eq.s32.totalorder %s857_s19, 1 }
  0x13   : > { %p1268_p9 = por %p145_p6, %p57_p1  ;;  %p939_p13 = scmp.lt.s32.totalorder %s1179_s17, 2 }
  0x14   : > { %s1273_s26 = scalar_select %p48_p7, %s1167_s14, %s50_s21  }
  0x15   : > { %p1275_p11 = por %p151_p10, %p63_p3  ;;  %s1466_s28 = sand.u32 1, %s1167_s14  }
  0x16   : > { %1477 = sst [smem:[#allocation17_spill]] %s1273_s26  ;;  %s1284_s29 = sshll.u32 %s1466_s28, 4 }
  0x17   : > { %s1287_s30 = sshll.u32 %s1175_s16, 8  ;;  %p1291_p0 = pnand %p939_p13, %p1256_p4 }
  0x18   : > { %s193_s5 = sand.u32 1, %s1179_s17   ;;  %s1480_s1 = sld [smem:[#allocation18_spill]] }
  0x19   : > { %s197_s9 = scalar_lea.vmem [#allocation8], %s1284_s29  ;;  %p869_p1 = scmp.ge.s32.totalorder %s1179_s17, 1 }
  0x1a   : > { %s205_s10 = sshll.u32 %s197_s9, 4  ;;  %p235_p2 = scmp.lt.s32.totalorder %s1179_s17, 3  ;;  %s206_s10 = int_to_ptr.vmem [resolvable:$true] %s205_s10 }
  0x1b   : > { %s1303_s11 = scalar_lea.sflag [#allocation9], %s193_s5  ;;  %p1013_p3 = pneg %p1291_p0 }
  0x1c   : > { %s1024_s19 = scalar_lea.vmem %s206_s10, 256  ;;  %s1181_s21 = smov [#allocation8]  }
  0x1d   : > { %p1025_p4 = scmp.ne.s32.totalorder %s206_s10, %s1024_s19  ;;  %s1029_s22 = sshll.u32 %s1181_s21, 4  ;;  %s1030_s22 = int_to_ptr.vmem [resolvable:$false] %s1029_s22 }
  0x1e   : > { %s204_s8 = scalar_lea.hbm %s1480_s1, %s1287_s30  ;;  %s1031_s23 = scalar_lea.vmem %s1030_s22, 512 }
  0x1f   : > { %p1027_p5 = pnand %p1025_p4, %p1013_p3  ;;  %p1032_p7 = scmp.lt.s32.totalorder %s206_s10, %s1030_s22 }
  0x20   : > { %p1033_p10 = scmp.lt.s32.totalorder %s1031_s23, %s1024_s19 }
  0x21   : > { %p1028_p6 = pneg %p1027_p5 }
  0x22   : > { %p1034_p13 = por %p1033_p10, %p1032_p7 }
  0x24   : > { %p1035_p12 = pnand %p1034_p13, %p1028_p6 }
  0x26   : > { %1038 = shalt.err (!%p1035_p12)
}
  0x27   : > { %s1469_s6 = smov 128   ;;  %s1183_s5 = smov 8  }
  0x28   : > { %931 = dma.hbm_to_vmem [thread:$0]  (!%p1291_p0), %s204_s8, 256, %s206_s10, %s1303_s11, %s1469_s6, %s1469_s6, %s1183_s5  }
  0x29   : > { %p1320_p4 = pnand %p869_p1, %p235_p2  ;;  %s182_s21 = scalar_lea.hbm %s1462_s0, %s1287_s30 }
  0x2a   : > { %s175_s22 = scalar_lea.vmem [#allocation5], %s1284_s29  ;;  %s226_s20 = scalar_lea.hbm %s1464_s2, %s1287_s30 }
  0x2b   : > { %s183_s23 = sshll.u32 %s175_s22, 4  ;;  %s1482_s16 = sand.u32 1, %s1167_s14   ;;  %s184_s23 = int_to_ptr.vmem [resolvable:$true] %s183_s23 }
  0x2c   : > { %s172_s26 = scalar_lea.sflag [#allocation6], %s1482_s16  ;;  %s1052_s8 = scalar_lea.vmem %s184_s23, 256 }
  0x2d   : > { %p1053_p12 = scmp.ne.s32.totalorder %s184_s23, %s1052_s8  ;;  %s1184_s10 = smov [#allocation5]  }
  0x2e   : > { %s1057_s6 = sshll.u32 %s1184_s10, 4  ;;  %s1058_s6 = int_to_ptr.vmem [resolvable:$false] %s1057_s6 }
  0x2f   : > { %p1055_p1 = pnand %p1053_p12, %p1013_p3  ;;  %s1059_s9 = scalar_lea.vmem %s1058_s6, 512 }
  0x30   : > { %p1060_p5 = scmp.lt.s32.totalorder %s184_s23, %s1058_s6  ;;  %p1061_p6 = scmp.lt.s32.totalorder %s1059_s9, %s1052_s8 }
  0x31   : > { %p1056_p2 = pneg %p1055_p1 }
  0x32   : > { %p1062_p7 = por %p1061_p6, %p1060_p5 }
  0x34   : > { %p1063_p10 = pnand %p1062_p7, %p1056_p2 }
  0x36   : > { %1066 = shalt.err (!%p1063_p10)
}
  0x37   : > { %s1483_s1 = smov 128   ;;  %s219_s16 = scalar_lea.vmem [#allocation10], %s1284_s29 }
  0x38   : > { %928 = dma.hbm_to_vmem [thread:$0]  (!%p1291_p0), %s182_s21, 256, %s184_s23, %s172_s26, %s1483_s1, %s1483_s1, %s1183_s5  }
  0x39   : > { %s227_s28 = sshll.u32 %s219_s16, 4  ;;  %s1185_s6 = smov [#allocation10]   ;;  %s228_s28 = int_to_ptr.vmem [resolvable:$true] %s227_s28 }
  0x3a   : > { %s1080_s19 = scalar_lea.vmem %s228_s28, 256  ;;  %s1085_s22 = sshll.u32 %s1185_s6, 4  ;;  %s1086_s22 = int_to_ptr.vmem [resolvable:$false] %s1085_s22 }
  0x3b   : > { %p1081_p13 = scmp.ne.s32.totalorder %s228_s28, %s1080_s19  ;;  %s1087_s8 = scalar_lea.vmem %s1086_s22, 512 }
  0x3c   : > { %p1088_p2 = scmp.lt.s32.totalorder %s228_s28, %s1086_s22  ;;  %p1089_p5 = scmp.lt.s32.totalorder %s1087_s8, %s1080_s19 }
  0x3d   : > { %p1083_p12 = pnand %p1081_p13, %p1013_p3 }
  0x3e   : > { %p1090_p6 = por %p1089_p5, %p1088_p2 }
  0x3f   : > { %p1084_p1 = pneg %p1083_p12 }
  0x41   : > { %p1091_p7 = pnand %p1090_p6, %p1084_p1 }
  0x43   : > { %1094 = shalt.err (!%p1091_p7)
}
  0x44   : > { %934 = dma.hbm_to_vmem [thread:$0]  (!%p1291_p0), %s226_s20, 256, %s228_s28, %s1303_s11, %s1483_s1, %s1483_s1, %s1183_s5  }
  0x45   : > { %239 = sbr.rel (%p1320_p4) target bundleno = 867 (0x363), region = 32  ;;  %s1361_s21 = sand.u32 (!%p1320_p4), 1, %s1163_s13  }
  0x46   : > { %s1364_s4 = sshll.u32 (!%p1320_p4), %s1361_s21, 4  ;;  %s242_s23 = scalar_lea.sflag (!%p1320_p4), [#allocation6], %s1361_s21 }
  0x47   : > { %s245_s10 = scalar_lea.vmem (!%p1320_p4), [#allocation5], %s1364_s4 }
  0x4a   : > { %1146 = dma.done.wait (%p1264_p8), %s242_s23, 256  }
  0x4b   : > { %1148 = vsyncadd (%p1264_p8), %s242_s23, 4294967040  ;;  %s250_s20 = sand.u32 1, %s1244_s18   ;;  %s254_s11 = scalar_lea.vmem [#allocation8], %s1364_s4 }
  0x4c   : > { %s251_s30 = scalar_lea.sflag [#allocation9], %s250_s20 }
  0x4d   : > { %1150 = dma.done.wait (%p1264_p8), %s251_s30, 512  }
  0x4e   : > { %1152 = vsyncadd (%p1264_p8), %s251_s30, 4294966784  ;;  %vm305_vm0 = vcmask 261120   ;;  %v1186_v0 = vmov 0.0   ;;  %vm1187_vm1 = vmmov 0   ;;  %v312_v1 = vld [vmem:[%s254_s11] sm:$0xff]  ;;  %v313_v2 = vld [vmem:[%s254_s11 + $0x8] sm:$0xff] }
  0x4f   : > { %897 = vmatprep.subr.mxu0 %v1186_v0  ;;  %306 = vst.msk [vmem:[#allocation4] sm:$0xff] %vm305_vm0, %v1186_v0  ;;  %307 = vst.msk [vmem:[#allocation4 + $0x8] sm:$0xff] %vm305_vm0, %v1186_v0  ;;  %902 = vmatprep.subr.mxu1 %v1186_v0  ;;  %v308_v3 = vld [vmem:[%s245_s10] sm:$0xff]  ;;  %v309_v5 = vld [vmem:[%s245_s10 + $0x8] sm:$0xff]  ;;  %vm300_vm2 = vcmask 7168   ;;  %v1188_v7 = vmov -inf  }
  0x50   : > { %899 = vmatprep.mubr.msk.f32.mxu0 %vm1187_vm1, %v1186_v0  ;;  %904 = vmatprep.mubr.msk.f32.mxu1 %vm1187_vm1, %v1186_v0  ;;  %v310_v4 = vmul.f32 0.17677669, %v308_v3  ;;  %v311_v6 = vmul.f32 0.17677669, %v309_v5  ;;  %301 = vst.msk [vmem:[#allocation2] sm:$0xff] %vm300_vm2, %v1188_v7  ;;  %302 = vst.msk [vmem:[#allocation2 + $0x8] sm:$0xff] %vm300_vm2, %v1188_v7 }
  0x51   : > { %898 = vmatpush3.xpose.msk.msra.mxu0 %vm305_vm0, %v312_v1  ;;  %903 = vmatpush3.xpose.msk.msra.mxu1 %vm305_vm0, %v313_v2  ;;  %303 = vst.msk [vmem:[#allocation3] sm:$0xff] %vm300_vm2, %v1186_v0  ;;  %304 = vst.msk [vmem:[#allocation3 + $0x8] sm:$0xff] %vm300_vm2, %v1186_v0  ;;  %vm471_vm3 = vcmask 64512   ;;  %v1189_v14 = vmov 0   ;;  %s263_s18 = scalar_lea.vmem [#allocation10], %s1364_s4  ;;  %s295_s24 = scalar_lea.vmem [#allocation11], %s1364_s4 }
  0x52   : > { %907 = vmatprep.subr.mxu0 %v1186_v0  ;;  %912 = vmatprep.subr.mxu1 %v1186_v0  ;;  %v314_v23 = vld [vmem:[%s263_s18] sm:$0xff]  ;;  %v315_v24 = vld [vmem:[%s263_s18 + $0x8] sm:$0xff]  ;;  %s721_s5 = sshll.u32 %s295_s24, 4  ;;  %s888_s7 = sshll.u32 %s1171_s15, 8  ;;  %s1407_s5 = int_to_ptr.vmem [resolvable:$true] %s721_s5 }
  0x53   : > { %997 = vset.pattern.permute.xlu1 %v1189_v14  ;;  %998 = vset.pattern.permute.xlu0 %v1189_v14  ;;  %s1413_s16 = scalar_lea.hbm %s1465_s3, %s888_s7  ;;  %s707_s28 = scalar_lea.sflag [#allocation7], %s1361_s21 }
  0x54   : > { %900 = vmatmul.mubr.msk.f32.vlgmr.msra.gmra.mxu0 %vm305_vm0, %v310_v4  ;;  %905 = vmatmul.mubr.msk.f32.vlgmr.msra.gmra.mxu1 %vm305_vm0, %v311_v6  ;;  %s1095_s19 = scalar_lea.vmem %s1407_s5, 256  ;;  %s1190_s15 = smov [#allocation11]  }
  0x55   : > { %909 = vmatprep.mubr.msk.f32.mxu0 %vm1187_vm1, %v1186_v0  ;;  %914 = vmatprep.mubr.msk.f32.mxu1 %vm1187_vm1, %v1186_v0  ;;  %p1096_p8 = scmp.ne.s32.totalorder %s1407_s5, %s1095_s19  ;;  %s1099_s6 = sshll.u32 %s1190_s15, 4  ;;  %s1100_s6 = int_to_ptr.vmem [resolvable:$false] %s1099_s6 }
  0x56   : > { %908 = vmatpush3.msra.mxu0 %v314_v23  ;;  %913 = vmatpush3.msra.mxu1 %v315_v24  ;;  %v517_v51 = vld [vmem:[#allocation4] sm:$0xff]  ;;  %v518_v54 = vld [vmem:[#allocation4 + $0x8] sm:$0xff]  ;;  %s1101_s22 = scalar_lea.vmem %s1100_s6, 512  ;;  %p1102_p4 = scmp.lt.s32.totalorder %s1407_s5, %s1100_s6 }
  0x57   : > { %v469_v15 = vld [vmem:[#allocation2] sm:$0xff]  ;;  %v470_v18 = vld [vmem:[#allocation2 + $0x8] sm:$0xff]  ;;  %p1097_p0 = pnand %p1096_p8, %p1268_p9  ;;  %p1103_p10 = scmp.lt.s32.totalorder %s1101_s22, %s1095_s19 }
  0x58   : > { %v502_v39 = vld [vmem:[#allocation3] sm:$0xff]  ;;  %v503_v42 = vld [vmem:[#allocation3 + $0x8] sm:$0xff] }
  0x59   : > { %p1098_p3 = pneg %p1097_p0  ;;  %p1104_p13 = por %p1103_p10, %p1102_p4 }
  0x5b   : > { %p1105_p12 = pnand %p1104_p13, %p1098_p3 }
 0x114   : > { %v389_v8 = vpop.f32.mrf.mxu0  ;;  %v465_v9 = vpop.f32.mrf.mxu1 }
 0x115   : > { %v472_v10 = vsel %vm471_vm3, %v389_v8, -inf  ;;  %v475_v13 = vsel %vm471_vm3, %v465_v9, -inf }
 0x116   : > { %473 = vmax.xlane.f32.xlu0 %v472_v10  ;;  %v901_v11 = vpop.f32.mrf.mxu0  ;;  %v906_v12 = vpop.f32.mrf.mxu1 }
 0x11a   : > { %476 = vmax.xlane.f32.xlu0 %v475_v13 }
 0x19f   : > { %v474_v16 = vpop.xlane.xlu0 %473 }
 0x1a0   : > { %v478_v17 = vmax.f32 %v469_v15, %v474_v16 }
 0x1a2   : > { %v480_v19 = vsub.f32 %v469_v15, %v478_v17  ;;  %681 = vst.msk [vmem:[#allocation2] sm:$0xff] %vm300_vm2, %v478_v17  ;;  %488 = vperm.xlu1 %997, %v478_v17  }
 0x1a3   : > { %v477_v20 = vpop.xlane.xlu0 %476 }
 0x1a4   : > { %v479_v21 = vmax.f32 %v470_v18, %v477_v20  ;;  %v482_v36 = vmul.f32 1.442695, %v480_v19 }
 0x1a6   : > { %v481_v22 = vsub.f32 %v470_v18, %v479_v21  ;;  %682 = vst.msk [vmem:[#allocation2 + $0x8] sm:$0xff] %vm300_vm2, %v479_v21  ;;  %493 = vperm.xlu1 %997, %v479_v21  }
 0x1a8   : > { %v484_v34 = vmul.f32 1.442695, %v481_v22 }
 0x21d   : > { %v489_v25 = vpop.permute.xlu1 %488 }
 0x21e   : > { %v496_v26 = vsub.f32 %v389_v8, %v489_v25 }
 0x220   : > { %v498_v27 = vmul.f32 1.442695, %v496_v26 }
 0x221   : > { %v494_v28 = vpop.permute.xlu1 %493 }
 0x222   : > { %999 = vpow2.f32 %v498_v27  ;;  %v497_v29 = vsub.f32 %v465_v9, %v494_v28 }
 0x224   : > { %v500_v30 = vmul.f32 1.442695, %v497_v29 }
 0x226   : > { %1001 = vpow2.f32 %v500_v30 }
 0x227   : > { %1003 = vpow2.f32 %v484_v34 }
 0x228   : > { %1005 = vpow2.f32 %v482_v36 }
 0x22f   : > { %v1000_v31 = vpop.eup %999 }
 0x230   : > { %910 = vmatmul.mubr.msk.f32.vlgmr.msra.gmra.mxu0 %vm471_vm3, %v1000_v31  ;;  %v506_v32 = vsel %vm471_vm3, %v1000_v31, 0.0 }
 0x231   : > { %507 = vadd.xlane.f32.xlu0 %v506_v32 }
 0x233   : > { %v1002_v33 = vpop.eup %1001 }
 0x234   : > { %915 = vmatmul.mubr.msk.f32.vlgmr.msra.gmra.mxu1 %vm471_vm3, %v1002_v33  ;;  %v509_v35 = vsel %vm471_vm3, %v1002_v33, 0.0  ;;  %v1004_v37 = vpop.eup %1003 }
 0x235   : > { %510 = vadd.xlane.f32.xlu1 %v509_v35  ;;  %v1006_v38 = vpop.eup %1005  ;;  %v505_v44 = vmul.f32 %v1004_v37, %v503_v42 }
 0x236   : > { %v504_v40 = vmul.f32 %v1006_v38, %v502_v39 }
 0x246   : > { %526 = vperm.xlu1 %997, %v1004_v37  }
 0x247   : > { %521 = vperm.xlu0 %998, %v1006_v38  }
 0x2ba   : > { %v508_v41 = vpop.xlane.xlu0 %507 }
 0x2bb   : > { %v512_v43 = vadd.f32 %v508_v41, %v504_v40 }
 0x2bd   : > { %515 = vst.msk [vmem:[#allocation3] sm:$0xff] %vm300_vm2, %v512_v43 }
 0x2be   : > { %v511_v45 = vpop.xlane.xlu1 %510 }
 0x2bf   : > { %v513_v46 = vadd.f32 %v511_v45, %v505_v44 }
 0x2c1   : > { %516 = vst.msk [vmem:[#allocation3 + $0x8] sm:$0xff] %vm300_vm2, %v513_v46 }
 0x2c2   : > { %v522_v52 = vpop.permute.xlu0 %521  ;;  %v527_v55 = vpop.permute.xlu1 %526 }
 0x2c3   : > { %v529_v53 = vmul.f32 %v522_v52, %v517_v51  ;;  %v530_v59 = vmul.f32 %v527_v55, %v518_v54 }
 0x2c4   : > { %v686_v47 = vld [vmem:[#allocation3] sm:$0xff] }
 0x2c5   : > { %1007 = vrcp.f32 %v686_v47 }
 0x2c8   : > { %v687_v48 = vld [vmem:[#allocation3 + $0x8] sm:$0xff] }
 0x2c9   : > { %1009 = vrcp.f32 %v687_v48 }
 0x2d2   : > { %v1008_v49 = vpop.eup %1007 }
 0x2d3   : > { %694 = vperm.xlu0 %998, %v1008_v49  }
 0x2d6   : > { %v1010_v50 = vpop.eup %1009 }
 0x2d7   : > { %699 = vperm.xlu0 %998, %v1010_v50  }
 0x2f0   : > { %v600_v56 = vpop.f32.mrf.mxu0 }
 0x2f1   : > { %v677_v57 = vadd.f32 %v600_v56, %v529_v53 }
 0x2f2   : > { %v911_v58 = vpop.f32.mrf.mxu0 }
 0x2f3   : > { %679 = vst.msk [vmem:[#allocation4] sm:$0xff] %vm305_vm0, %v677_v57 }
 0x2f4   : > { %v673_v60 = vpop.f32.mrf.mxu1 }
 0x2f5   : > { %v678_v61 = vadd.f32 %v673_v60, %v530_v59 }
 0x2f6   : > { %v916_v62 = vpop.f32.mrf.mxu1 }
 0x2f7   : > { %680 = vst.msk [vmem:[#allocation4 + $0x8] sm:$0xff] %vm305_vm0, %v678_v61 }
 0x2fa   : > { %v690_v63 = vld [vmem:[#allocation4] sm:$0xff] }
 0x2fe   : > { %v691_v2 = vld [vmem:[#allocation4 + $0x8] sm:$0xff] }
 0x34e   : > { %v695_v0 = vpop.permute.xlu0 %694 }
 0x34f   : > { %v702_v1 = vmul.f32 %v695_v0, %v690_v63 }
 0x351   : > { %704 = vst.msk [vmem:[%s295_s24] sm:$0xff] %vm305_vm0, %v702_v1 }
 0x352   : > { %v700_v3 = vpop.permute.xlu0 %699 }
 0x353   : > { %v703_v4 = vmul.f32 %v700_v3, %v691_v2 }
 0x355   : > { %705 = vst.msk [vmem:[%s295_s24 + $0x8] sm:$0xff] %vm305_vm0, %v703_v4 }
 0x356   : > { %1108 = shalt.err (!%p1105_p12)
}
 0x357   : > { %s1109_s8 = scalar_lea.hbm %s1413_s16, 256  ;;  %s1113_s4 = scalar_lea.hbm %s1465_s3, 512 }
 0x358   : > { %p1110_p1 = scmp.ne.s32.totalorder %s1413_s16, %s1109_s8  ;;  %p1114_p6 = scmp.lt.s32.totalorder %s1413_s16, %s1465_s3 }
 0x359   : > { %p1115_p7 = scmp.lt.s32.totalorder %s1113_s4, %s1109_s8 }
 0x35a   : > { %p1111_p2 = pnand %p1110_p1, %p1268_p9 }
 0x35b   : > { %p1116_p8 = por %p1115_p7, %p1114_p6 }
 0x35c   : > { %p1112_p5 = pneg %p1111_p2 }
 0x35e   : > { %p1117_p0 = pnand %p1116_p8, %p1112_p5 }
 0x360   : > { %1120 = shalt.err (!%p1117_p0)
}
 0x361   : > { %s1191_s20 = smov 128   ;;  %s1192_s30 = smov 8  }
 0x362   : > { %923 = dma.vmem_to_hbm [thread:$0]  (%p1268_p9), %s1407_s5, 256, %s1413_s16, %s707_s28, %s1191_s20, %s1191_s20, %s1192_s30  }
 0x363 PF: > { %s736_s11 = sand.u32 1, %s1159_s12   ;;  %p1484_p3 = scmp.ge.s32.totalorder %s1179_s17, 2 }
 0x364   : > { %s737_s18 = scalar_lea.sflag [#allocation7], %s736_s11 }
 0x365   : > { %p936_p4 = pnand %p1484_p3, %p1275_p11 }
 0x367   : > { %p937_p10 = pneg %p936_p4 }
 0x369   : > { %1154 = dma.done.wait (%p937_p10), %s737_s18, 256  }
 0x36a   : > { %1156 = vsyncadd (%p937_p10), %s737_s18, 4294967040  ;;  %s22_s17 = sadd.s32 1, %s1179_s17   ;;  %s1485_s25 = sld [smem:[#allocation17_spill]] }
 0x36b   : > { %p19_p13 = scmp.ge.s32.totalorder %s22_s17, 4   ;;  %s1486_s15 = sld [smem:[#allocation15_spill]] }
 0x36c   : > { %s1487_s16 = sld [smem:[#allocation16_spill]]  ;;  %s1488_s12 = smov %s1163_s13 }
 0x36d   : > { %s1489_s13 = smov %s1167_s14  ;;  %21 = sbr.rel (!%p19_p13) target bundleno = 10 (0xa), region = 109 }
 0x370   : > { %s1490_s14 = smov %s1485_s25 }
 0x372   :  { %742 = vsyncpa [#allocation6], 1 }
 0x373   :  { %744 = vsyncpa [#allocation6 + $0x1], 1 }
 0x374   :  { %745 = vsyncpa [#allocation9], 1 }
 0x375   :  { %747 = vsyncpa [#allocation9 + $0x1], 1 }
 0x376   :  { %748 = vsyncpa [#allocation7], 1 }
 0x377   :  { %750 = vsyncpa [#allocation7 + $0x1], 1 }

</bundles_post_ra>
